<compile_context>
chip_gen: v5e
topology: v5e:2x2
jax: 0.10.0
libtpu: 0.0.40
codegen_flags: <defaults>
</compile_context>

<pallas_src>
import functools

import jax
import jax.numpy as jnp
from jax.experimental import pallas as pl
from jax.experimental.pallas import tpu as pltpu

LANE = 128


def _round_up(x, m):
    return ((x + m - 1) // m) * m


def _pad2d(x, rows, cols):
    return jnp.pad(x, ((0, rows - x.shape[0]), (0, cols - x.shape[1])))


@functools.lru_cache(maxsize=None)
def _vmem_limit_bytes():
    """Scoped VMEM limit per TPU generation (~78% of physical, capped at 100 MiB)."""
    cap = None
    try:
        info = pltpu.get_tpu_info()
        cap = getattr(info, "vmem_capacity_bytes", None)
    except Exception:
        cap = None
    if not cap:
        cap = 64 * 1024 * 1024  # conservative fallback (v7x per-core VMEM)
    return int(min(int(cap * 0.78), 100 * 1024 * 1024))


def _fused_fits(n_pad, f_max, vmem_limit):
    """Conservative footprint check for the single-call fused path."""
    need = (2 * n_pad * n_pad * 2        # Â (bf16), counted double-buffered
            + 2 * n_pad * f_max * 2      # X (bf16)
            + 2 * n_pad * f_max * 4      # output (f32)
            + 6 * n_pad * f_max * 4      # live f32 intermediates in the body
            + 4 * f_max * f_max * 4)     # W1-3 + biases (f32, resident)
    return need <= int(vmem_limit * 0.6)


def _pick_tiles(n128, f_pad, vmem_limit):
    """Largest square Â tile (multiple of 128) whose full footprint fits VMEM."""
    budget = int(vmem_limit * 0.7)
    for t in (2048, 1024, 512, 256, 128):
        if t > max(LANE, n128):
            continue
        need = (2 * t * t * 2            # Â tile, double-buffered (bf16)
                + 2 * t * f_pad * 2      # H tile, double-buffered (bf16)
                + f_pad * f_pad * 4      # W resident (f32)
                + 8 * f_pad * 4          # bias resident (f32, sublane-padded)
                + 2 * t * f_pad * 4      # output tile, double-buffered (<= f32)
                + t * f_pad * 4          # f32 accumulator scratch
                + 2 * t * f_pad * 4)     # in-kernel f32 temporaries
        if need <= budget:
            return t, t
    return LANE, LANE


# ---------------------------------------------------------------------------
# Kernels
# ---------------------------------------------------------------------------

def _log_softmax_masked(y, num_classes):
    """Row-wise log_softmax over the first `num_classes` lanes (rest padded)."""
    lane = jax.lax.broadcasted_iota(jnp.int32, y.shape, dimension=1)
    y = jnp.where(lane < num_classes, y, jnp.float32(-1e30))
    m = jnp.max(y, axis=1, keepdims=True)
    lse = jnp.log(jnp.sum(jnp.exp(y - m), axis=1, keepdims=True)) + m
    return y - lse


def gcn_fused_kernel(a_ref, x_ref, w1_ref, b1_ref, w2_ref, b2_ref, w3_ref, b3_ref,
                     out_ref, *, num_classes):
    """All three GCN layers with Â fully VMEM-resident (small / medium graphs)."""
    f32, bf16 = jnp.float32, jnp.bfloat16
    a = a_ref[...]                                            # (n_pad, n_pad) bf16

    def conv(h_bf16, w_ref_, b_ref_):
        t = jnp.dot(a, h_bf16, preferred_element_type=f32)    # bf16 MXU, f32 acc
        return jnp.dot(t, w_ref_[...], preferred_element_type=f32) + b_ref_[...]

    h = jnp.maximum(conv(x_ref[...], w1_ref, b1_ref), 0.0).astype(bf16)
    # TODO(synk): training-mode dropout (p=0.6) not implemented (eval = identity).
    h = jnp.maximum(conv(h, w2_ref, b2_ref), 0.0).astype(bf16)
    y = conv(h, w3_ref, b3_ref)
    out_ref[...] = _log_softmax_masked(y, num_classes).astype(out_ref.dtype)


def gcn_layer_tiled_kernel(a_ref, h_ref, w_ref, b_ref, out_ref, acc_ref, *,
                           apply_relu, apply_log_softmax, num_classes):
    """One GCN layer, row-tiled and K-tiled over Â with an f32 accumulator.

    a_ref : (tile_n, tile_k)   bf16  Â block (streamed)
    h_ref : (tile_k, f_in)     bf16  H block (streamed along K)
    w_ref : (f_in, f_out)      f32   weights (VMEM resident)
    b_ref : (1, f_out)         f32   bias (resident)
    out   : (tile_n, f_out)          written only at the last K step
    acc   : (tile_n, f_in)     f32   scratch accumulator for Â @ H
    """
    k = pl.program_id(1)

    @pl.when(k == 0)
    def _():
        acc_ref[...] = jnp.zeros_like(acc_ref)

    acc_ref[...] += jnp.dot(a_ref[...], h_ref[...],
                            preferred_element_type=jnp.float32)

    @pl.when(k == pl.num_programs(1) - 1)
    def _():
        # Apply W once per row tile, in f32 (no bf16 cast of the Â@H partial).
        y = jnp.dot(acc_ref[...], w_ref[...], preferred_element_type=jnp.float32)
        y = y + b_ref[...]
        if apply_relu:
            y = jnp.maximum(y, 0.0)
            # TODO(synk): training-mode dropout (p=0.6) not implemented (eval = identity).
        if apply_log_softmax:
            y = _log_softmax_masked(y, num_classes)
        out_ref[...] = y.astype(out_ref.dtype)


# ---------------------------------------------------------------------------
# pallas_call wrappers
# ---------------------------------------------------------------------------

def _resident_spec(shape):
    return pl.BlockSpec(shape, lambda i: (0,) * len(shape))


def _gcn_fused(a, x, w1, b1, w2, b2, w3, b3, *, num_classes, vmem_limit):
    n_pad = a.shape[0]
    f3 = w3.shape[1]
    kernel = functools.partial(gcn_fused_kernel, num_classes=num_classes)
    return pl.pallas_call(
        kernel,
        out_shape=jax.ShapeDtypeStruct((n_pad, f3), jnp.float32),
        grid_spec=pltpu.PrefetchScalarGridSpec(
            num_scalar_prefetch=0,
            grid=(1,),
            in_specs=[_resident_spec(arr.shape)
                      for arr in (a, x, w1, b1, w2, b2, w3, b3)],
            out_specs=pl.BlockSpec((n_pad, f3), lambda i: (0, 0)),
        ),
        compiler_params=pltpu.CompilerParams(
            dimension_semantics=("arbitrary",),
            vmem_limit_bytes=vmem_limit,
        ),
    )(a, x, w1, b1, w2, b2, w3, b3)


def _gcn_layer_tiled(a, h, w, b, *, apply_relu, apply_log_softmax, num_classes,
                     out_dtype, tile_n, tile_k, vmem_limit):
    n_pad = a.shape[0]
    f_in = h.shape[1]
    f_out = w.shape[1]
    kernel = functools.partial(
        gcn_layer_tiled_kernel, apply_relu=apply_relu,
        apply_log_softmax=apply_log_softmax, num_classes=num_classes)
    return pl.pallas_call(
        kernel,
        out_shape=jax.ShapeDtypeStruct((n_pad, f_out), out_dtype),
        grid_spec=pltpu.PrefetchScalarGridSpec(
            num_scalar_prefetch=0,
            grid=(n_pad // tile_n, n_pad // tile_k),
            in_specs=[
                pl.BlockSpec((tile_n, tile_k), lambda i, k: (i, k)),  # Â block
                pl.BlockSpec((tile_k, f_in), lambda i, k: (k, 0)),    # H block
                pl.BlockSpec((f_in, f_out), lambda i, k: (0, 0)),     # W resident
                pl.BlockSpec((1, f_out), lambda i, k: (0, 0)),        # b resident
            ],
            out_specs=pl.BlockSpec((tile_n, f_out), lambda i, k: (i, 0)),
            scratch_shapes=[pltpu.VMEM((tile_n, f_in), jnp.float32)],
        ),
        compiler_params=pltpu.CompilerParams(
            # Row tiles shard across v7x's 2 TensorCores; K is the reduction.
            dimension_semantics=("parallel", "arbitrary"),
            vmem_limit_bytes=vmem_limit,
        ),
    )(a, h, w, b)


# ---------------------------------------------------------------------------
# Model forward
# ---------------------------------------------------------------------------

def simple_gcn_forward(a_hat, x, params, *, force_tiled=False):
    """Eval-mode forward of SimpleGCNModel.  Returns log-probs [N, output_dim]."""
    w1, b1, w2, b2, w3, b3 = params
    n = x.shape[0]
    output_dim = w3.shape[1]

    # Zero-pad every feature dim to 128 lanes (exact math; lane-dense stores).
    f0 = _round_up(x.shape[1], LANE)
    f1 = _round_up(w1.shape[1], LANE)
    f2 = _round_up(w2.shape[1], LANE)
    f3 = _round_up(w3.shape[1], LANE)
    f_max = max(f0, f1, f2, f3)

    vmem_limit = _vmem_limit_bytes()
    bf16, f32 = jnp.bfloat16, jnp.float32

    use_fused = (not force_tiled) and _fused_fits(_round_up(n, LANE), f_max, vmem_limit)
    if use_fused:
        n_pad = _round_up(n, LANE)
        tile_n = tile_k = n_pad
    else:
        tile_n, tile_k = _pick_tiles(_round_up(n, LANE), f_max, vmem_limit)
        n_pad = _round_up(n, max(tile_n, tile_k))

    a_p = _pad2d(a_hat, n_pad, n_pad).astype(bf16)
    x_p = _pad2d(x, n_pad, f0).astype(bf16)
    w1_p = _pad2d(w1, f0, f1).astype(f32)
    w2_p = _pad2d(w2, f1, f2).astype(f32)
    w3_p = _pad2d(w3, f2, f3).astype(f32)
    b1_p = _pad2d(b1, 1, f1).astype(f32)
    b2_p = _pad2d(b2, 1, f2).astype(f32)
    b3_p = _pad2d(b3, 1, f3).astype(f32)

    if use_fused:
        # Â read from HBM once; all three layers in a single kernel body.
        out = _gcn_fused(a_p, x_p, w1_p, b1_p, w2_p, b2_p, w3_p, b3_p,
                         num_classes=output_dim, vmem_limit=vmem_limit)
    else:
        h1 = _gcn_layer_tiled(a_p, x_p, w1_p, b1_p, apply_relu=True,
                              apply_log_softmax=False, num_classes=0,
                              out_dtype=bf16, tile_n=tile_n, tile_k=tile_k,
                              vmem_limit=vmem_limit)
        h2 = _gcn_layer_tiled(a_p, h1, w2_p, b2_p, apply_relu=True,
                              apply_log_softmax=False, num_classes=0,
                              out_dtype=bf16, tile_n=tile_n, tile_k=tile_k,
                              vmem_limit=vmem_limit)
        out = _gcn_layer_tiled(a_p, h2, w3_p, b3_p, apply_relu=False,
                               apply_log_softmax=True, num_classes=output_dim,
                               out_dtype=f32, tile_n=tile_n, tile_k=tile_k,
                               vmem_limit=vmem_limit)
    return out[:n, :output_dim]


def build_normalized_adjacency(edge_index, num_nodes):
    """Dense Â = D^-1/2 (A + I) D^-1/2 (GCNConv propagation with self-loops)."""
    src, dst = edge_index[0], edge_index[1]
    a = jnp.zeros((num_nodes, num_nodes), jnp.float32)
    a = a.at[dst, src].set(1.0)                                  # messages flow src -> dst
    a = jnp.maximum(a, jnp.eye(num_nodes, dtype=jnp.float32))    # self-loops, no doubling
    deg = jnp.sum(a, axis=1)
    d_inv_sqrt = jnp.where(deg > 0, 1.0 / jnp.sqrt(deg), 0.0)
    return d_inv_sqrt[:, None] * a * d_inv_sqrt[None, :]


def reference_forward(a_hat, x, params):
    """Plain-JAX reference: bf16-rounded Â/X/H streams, f32 math (as the kernels)."""
    w1, b1, w2, b2, w3, b3 = params
    bf16, f32 = jnp.bfloat16, jnp.float32
    a = a_hat.astype(bf16).astype(f32)
    h = x.astype(bf16).astype(f32)

    def conv(hh, w, b):
        return a @ (hh @ w) + b

    h = jnp.maximum(conv(h, w1, b1), 0.0).astype(bf16).astype(f32)
    h = jnp.maximum(conv(h, w2, b2), 0.0).astype(bf16).astype(f32)
    h = conv(h, w3, b3)
    return jax.nn.log_softmax(h, axis=1)


def glorot(key, shape):
    fan_in, fan_out = shape
    limit = jnp.sqrt(6.0 / (fan_in + fan_out))
    return jax.random.uniform(key, shape, jnp.float32, -limit, limit)


def ring_edge_index(num_nodes):
    idx = jnp.arange(num_nodes)
    src = jnp.concatenate([idx, (idx + 1) % num_nodes])
    dst = jnp.concatenate([(idx + 1) % num_nodes, idx])
    return jnp.stack([src, dst], axis=0)


if __name__ == "__main__":
    # Small, deterministic problem sizes consistent with the module.
    num_nodes = 8
    input_dim = 16
    hidden_dim1 = 16
    hidden_dim2 = 32
    output_dim = 2

    key = jax.random.PRNGKey(0)
    kx, k1, k2, k3, kx2 = jax.random.split(key, 5)

    x = jax.random.normal(kx, (num_nodes, input_dim), jnp.float32)
    edge_index = ring_edge_index(num_nodes)
    a_hat = build_normalized_adjacency(edge_index, num_nodes)   # built once, outside kernels

    w1 = glorot(k1, (input_dim, hidden_dim1))
    b1 = jnp.zeros((1, hidden_dim1), jnp.float32)
    w2 = glorot(k2, (hidden_dim1, hidden_dim2))
    b2 = jnp.zeros((1, hidden_dim2), jnp.float32)
    w3 = glorot(k3, (hidden_dim2, output_dim))
    b3 = jnp.zeros((1, output_dim), jnp.float32)
    params = (w1, b1, w2, b2, w3, b3)

    # 1) Fused single-kernel path (Â fits in VMEM).
    fwd = jax.jit(lambda a, xx: simple_gcn_forward(a, xx, params))
    out = jax.block_until_ready(fwd(a_hat, x))
    assert out.shape == (num_nodes, output_dim)
    assert jnp.allclose(jnp.sum(jnp.exp(out), axis=1), 1.0, atol=1e-4)
    ref = reference_forward(a_hat, x, params)
    assert jnp.allclose(out, ref, atol=2e-2, rtol=2e-2), float(jnp.max(jnp.abs(out - ref)))

    # 2) Row/K-tiled streaming path (large-graph code path), exercised on a
    #    graph whose size is NOT a tile multiple to also cover padding.
    n2 = 300
    x2 = jax.random.normal(kx2, (n2, input_dim), jnp.float32)
    a_hat2 = build_normalized_adjacency(ring_edge_index(n2), n2)
    fwd_tiled = jax.jit(lambda a, xx: simple_gcn_forward(a, xx, params, force_tiled=True))
    out2 = jax.block_until_ready(fwd_tiled(a_hat2, x2))
    assert out2.shape == (n2, output_dim)
    assert jnp.allclose(jnp.sum(jnp.exp(out2), axis=1), 1.0, atol=1e-4)
    ref2 = reference_forward(a_hat2, x2, params)
    assert jnp.allclose(out2, ref2, atol=2e-2, rtol=2e-2), float(jnp.max(jnp.abs(out2 - ref2)))

    print("KERNEL_OK")
</pallas_src>

<mosaic_0001>
module attributes {stable_mosaic.version = 11 : i64} {
  func.func @gcn_fused_kernel(%arg0: i32, %arg1: memref<128x128xbf16, #tpu.memory_space<vmem>>, %arg2: memref<128x128xbf16, #tpu.memory_space<vmem>>, %arg3: memref<128x128xf32, #tpu.memory_space<vmem>>, %arg4: memref<1x128xf32, #tpu.memory_space<vmem>>, %arg5: memref<128x128xf32, #tpu.memory_space<vmem>>, %arg6: memref<1x128xf32, #tpu.memory_space<vmem>>, %arg7: memref<128x128xf32, #tpu.memory_space<vmem>>, %arg8: memref<1x128xf32, #tpu.memory_space<vmem>>, %arg9: memref<128x128xf32, #tpu.memory_space<vmem>>) attributes {dimension_semantics = [#tpu.dimension_semantics<arbitrary>], iteration_bounds = array<i64: 1>, scalar_prefetch = 0 : i64, scratch_operands = 0 : i64, tpu.core_type = #tpu.core_type<tc>, window_params = [{pipeline_mode = #tpu.pipeline_mode<synchronous>, transform_indices = @transform_0, window_bounds = array<i64: 128, 128>}, {pipeline_mode = #tpu.pipeline_mode<synchronous>, transform_indices = @transform_1, window_bounds = array<i64: 128, 128>}, {pipeline_mode = #tpu.pipeline_mode<synchronous>, transform_indices = @transform_2, window_bounds = array<i64: 128, 128>}, {pipeline_mode = #tpu.pipeline_mode<synchronous>, transform_indices = @transform_3, window_bounds = array<i64: 1, 128>}, {pipeline_mode = #tpu.pipeline_mode<synchronous>, transform_indices = @transform_4, window_bounds = array<i64: 128, 128>}, {pipeline_mode = #tpu.pipeline_mode<synchronous>, transform_indices = @transform_5, window_bounds = array<i64: 1, 128>}, {pipeline_mode = #tpu.pipeline_mode<synchronous>, transform_indices = @transform_6, window_bounds = array<i64: 128, 128>}, {pipeline_mode = #tpu.pipeline_mode<synchronous>, transform_indices = @transform_7, window_bounds = array<i64: 1, 128>}, {pipeline_mode = #tpu.pipeline_mode<synchronous>, transform_indices = @transform_8, window_bounds = array<i64: 128, 128>}]} {
    %c0 = arith.constant 0 : index
    %c0_0 = arith.constant 0 : index
    %0 = vector.load %arg1[%c0, %c0_0] : memref<128x128xbf16, #tpu.memory_space<vmem>>, vector<128x128xbf16>
    %c0_1 = arith.constant 0 : index
    %c0_2 = arith.constant 0 : index
    %1 = vector.load %arg2[%c0_1, %c0_2] : memref<128x128xbf16, #tpu.memory_space<vmem>>, vector<128x128xbf16>
    %cst = arith.constant dense<0.000000e+00> : vector<128x128xf32>
    %2 = tpu.matmul %0, %1, %cst {dimension_numbers = #tpu.dot_dimension_numbers<[1], [0], [0], [1], [0, 0, 1, 1], [], []>} : vector<128x128xbf16>, vector<128x128xbf16>, vector<128x128xf32> -> vector<128x128xf32>
    %c0_3 = arith.constant 0 : index
    %c0_4 = arith.constant 0 : index
    %3 = vector.load %arg3[%c0_3, %c0_4] : memref<128x128xf32, #tpu.memory_space<vmem>>, vector<128x128xf32>
    %cst_5 = arith.constant dense<0.000000e+00> : vector<128x128xf32>
    %4 = tpu.matmul %2, %3, %cst_5 {dimension_numbers = #tpu.dot_dimension_numbers<[1], [0], [0], [1], [0, 0, 1, 1], [], []>} : vector<128x128xf32>, vector<128x128xf32>, vector<128x128xf32> -> vector<128x128xf32>
    %c0_6 = arith.constant 0 : index
    %c0_7 = arith.constant 0 : index
    %5 = vector.load %arg4[%c0_6, %c0_7] : memref<1x128xf32, #tpu.memory_space<vmem>>, vector<1x128xf32>
    %6 = vector.broadcast %5 : vector<1x128xf32> to vector<128x128xf32>
    %7 = arith.addf %4, %6 : vector<128x128xf32>
    %cst_8 = arith.constant 0.000000e+00 : f32
    %8 = vector.broadcast %cst_8 : f32 to vector<128x128xf32>
    %9 = arith.maximumf %7, %8 : vector<128x128xf32>
    %10 = arith.truncf %9 : vector<128x128xf32> to vector<128x128xbf16>
    %cst_9 = arith.constant dense<0.000000e+00> : vector<128x128xf32>
    %11 = tpu.matmul %0, %10, %cst_9 {dimension_numbers = #tpu.dot_dimension_numbers<[1], [0], [0], [1], [0, 0, 1, 1], [], []>} : vector<128x128xbf16>, vector<128x128xbf16>, vector<128x128xf32> -> vector<128x128xf32>
    %c0_10 = arith.constant 0 : index
    %c0_11 = arith.constant 0 : index
    %12 = vector.load %arg5[%c0_10, %c0_11] : memref<128x128xf32, #tpu.memory_space<vmem>>, vector<128x128xf32>
    %cst_12 = arith.constant dense<0.000000e+00> : vector<128x128xf32>
    %13 = tpu.matmul %11, %12, %cst_12 {dimension_numbers = #tpu.dot_dimension_numbers<[1], [0], [0], [1], [0, 0, 1, 1], [], []>} : vector<128x128xf32>, vector<128x128xf32>, vector<128x128xf32> -> vector<128x128xf32>
    %c0_13 = arith.constant 0 : index
    %c0_14 = arith.constant 0 : index
    %14 = vector.load %arg6[%c0_13, %c0_14] : memref<1x128xf32, #tpu.memory_space<vmem>>, vector<1x128xf32>
    %15 = vector.broadcast %14 : vector<1x128xf32> to vector<128x128xf32>
    %16 = arith.addf %13, %15 : vector<128x128xf32>
    %cst_15 = arith.constant 0.000000e+00 : f32
    %17 = vector.broadcast %cst_15 : f32 to vector<128x128xf32>
    %18 = arith.maximumf %16, %17 : vector<128x128xf32>
    %19 = arith.truncf %18 : vector<128x128xf32> to vector<128x128xbf16>
    %cst_16 = arith.constant dense<0.000000e+00> : vector<128x128xf32>
    %20 = tpu.matmul %0, %19, %cst_16 {dimension_numbers = #tpu.dot_dimension_numbers<[1], [0], [0], [1], [0, 0, 1, 1], [], []>} : vector<128x128xbf16>, vector<128x128xbf16>, vector<128x128xf32> -> vector<128x128xf32>
    %c0_17 = arith.constant 0 : index
    %c0_18 = arith.constant 0 : index
    %21 = vector.load %arg7[%c0_17, %c0_18] : memref<128x128xf32, #tpu.memory_space<vmem>>, vector<128x128xf32>
    %cst_19 = arith.constant dense<0.000000e+00> : vector<128x128xf32>
    %22 = tpu.matmul %20, %21, %cst_19 {dimension_numbers = #tpu.dot_dimension_numbers<[1], [0], [0], [1], [0, 0, 1, 1], [], []>} : vector<128x128xf32>, vector<128x128xf32>, vector<128x128xf32> -> vector<128x128xf32>
    %c0_20 = arith.constant 0 : index
    %c0_21 = arith.constant 0 : index
    %23 = vector.load %arg8[%c0_20, %c0_21] : memref<1x128xf32, #tpu.memory_space<vmem>>, vector<1x128xf32>
    %24 = vector.broadcast %23 : vector<1x128xf32> to vector<128x128xf32>
    %25 = arith.addf %22, %24 : vector<128x128xf32>
    %26 = tpu.iota {dimensions = array<i32: 1>} : vector<128x128xi32>
    %c2_i32 = arith.constant 2 : i32
    %27 = vector.broadcast %c2_i32 : i32 to vector<128x128xi32>
    %28 = arith.cmpi slt, %26, %27 : vector<128x128xi32>
    %cst_22 = arith.constant -1.000000e+30 : f32
    %29 = vector.broadcast %cst_22 : f32 to vector<128x128xf32>
    %30 = arith.select %28, %25, %29 : vector<128x128xi1>, vector<128x128xf32>
    %cst_23 = arith.constant dense<0xFF800000> : vector<128xf32>
    %31 = vector.multi_reduction <maximumf>, %30, %cst_23 [1] : vector<128x128xf32> to vector<128xf32>
    %32 = vector.shape_cast %31 : vector<128xf32> to vector<128x1xf32>
    %33 = vector.broadcast %32 : vector<128x1xf32> to vector<128x128xf32>
    %34 = arith.subf %30, %33 : vector<128x128xf32>
    %35 = math.exp %34 : vector<128x128xf32>
    %cst_24 = arith.constant dense<0.000000e+00> : vector<128xf32>
    %36 = vector.multi_reduction <add>, %35, %cst_24 [1] : vector<128x128xf32> to vector<128xf32>
    %37 = vector.shape_cast %36 : vector<128xf32> to vector<128x1xf32>
    %38 = math.log %37 : vector<128x1xf32>
    %39 = arith.addf %38, %32 : vector<128x1xf32>
    %40 = vector.broadcast %39 : vector<128x1xf32> to vector<128x128xf32>
    %41 = arith.subf %30, %40 : vector<128x128xf32>
    %c0_25 = arith.constant 0 : index
    %c0_26 = arith.constant 0 : index
    %42 = vector.load %arg9[%c0_25, %c0_26] : memref<128x128xf32, #tpu.memory_space<vmem>>, vector<128x128xf32>
    tpu.vector_store %arg9[%c0_25, %c0_26], %41 {strides = array<i32>} : memref<128x128xf32, #tpu.memory_space<vmem>>, vector<128x128xf32>,
    return
  }
  func.func @transform_0(%arg0: i32) -> (i32, i32) {
    %c0_i32 = arith.constant 0 : i32
    %c0_i32_0 = arith.constant 0 : i32
    %c0_i32_1 = arith.constant 0 : i32
    return %c0_i32, %c0_i32_0 : i32, i32
  }
  func.func @transform_1(%arg0: i32) -> (i32, i32) {
    %c0_i32 = arith.constant 0 : i32
    %c0_i32_0 = arith.constant 0 : i32
    %c0_i32_1 = arith.constant 0 : i32
    return %c0_i32, %c0_i32_0 : i32, i32
  }
  func.func @transform_2(%arg0: i32) -> (i32, i32) {
    %c0_i32 = arith.constant 0 : i32
    %c0_i32_0 = arith.constant 0 : i32
    %c0_i32_1 = arith.constant 0 : i32
    return %c0_i32, %c0_i32_0 : i32, i32
  }
  func.func @transform_3(%arg0: i32) -> (i32, i32) {
    %c0_i32 = arith.constant 0 : i32
    %c0_i32_0 = arith.constant 0 : i32
    %c0_i32_1 = arith.constant 0 : i32
    return %c0_i32, %c0_i32_0 : i32, i32
  }
  func.func @transform_4(%arg0: i32) -> (i32, i32) {
    %c0_i32 = arith.constant 0 : i32
    %c0_i32_0 = arith.constant 0 : i32
    %c0_i32_1 = arith.constant 0 : i32
    return %c0_i32, %c0_i32_0 : i32, i32
  }
  func.func @transform_5(%arg0: i32) -> (i32, i32) {
    %c0_i32 = arith.constant 0 : i32
    %c0_i32_0 = arith.constant 0 : i32
    %c0_i32_1 = arith.constant 0 : i32
    return %c0_i32, %c0_i32_0 : i32, i32
  }
  func.func @transform_6(%arg0: i32) -> (i32, i32) {
    %c0_i32 = arith.constant 0 : i32
    %c0_i32_0 = arith.constant 0 : i32
    %c0_i32_1 = arith.constant 0 : i32
    return %c0_i32, %c0_i32_0 : i32, i32
  }
  func.func @transform_7(%arg0: i32) -> (i32, i32) {
    %c0_i32 = arith.constant 0 : i32
    %c0_i32_0 = arith.constant 0 : i32
    %c0_i32_1 = arith.constant 0 : i32
    return %c0_i32, %c0_i32_0 : i32, i32
  }
  func.func @transform_8(%arg0: i32) -> (i32, i32) {
    %c0_i32 = arith.constant 0 : i32
    %c0_i32_0 = arith.constant 0 : i32
    %c0_i32_1 = arith.constant 0 : i32
    return %c0_i32, %c0_i32_0 : i32, i32
  }
}

</mosaic_0001>

<bundles_post_ra>
// kernel: _lambda_.1
= control target key start
LH: loop header
LB: loop body
LE: loop exit
PB: predicated region body
PF: predicated region fallthrough
CT: control target
= control target key end

     0   :  { %13 = vsyncpa [#allocation3], 0  ;;  %s1528_s0 = inlined_call_operand.vmem [shape: bf16[128,128], index: 0, kind: input, shape index: {}]   ;;  %s1529_s1 = inlined_call_operand.vmem [shape: bf16[128,128], index: 1, kind: input, shape index: {}]   ;;  %s1530_s2 = inlined_call_operand.hbm [shape: f32[128,128], index: 2, kind: input, shape index: {}]   ;;  %s1531_s3 = inlined_call_operand.vmem [shape: f32[1,128], index: 3, kind: input, shape index: {}]   ;;  %s1532_s4 = inlined_call_operand.hbm [shape: f32[128,128], index: 4, kind: input, shape index: {}]   ;;  %s1533_s5 = inlined_call_operand.vmem [shape: f32[1,128], index: 5, kind: input, shape index: {}]   ;;  %s1534_s6 = inlined_call_operand.vmem [shape: f32[128,128], index: 6, kind: input, shape index: {}]   ;;  %s1535_s7 = inlined_call_operand.vmem [shape: f32[1,128], index: 7, kind: input, shape index: {}]   ;;  %s1536_s8 = inlined_call_operand.vmem [shape: f32[128,128], index: 8, kind: output, shape index: {}]  }
   0x1   :  { %s23_s29 = sshll.u32 %s1530_s2, 4  ;;  %s24_s29 = int_to_ptr.hbm [resolvable:$true] %s23_s29 }
   0x2   :  { %14 = vsyncpa [#allocation5], 0  ;;  %s1083_s30 = smov [#allocation2]   ;;  %s38_s12 = sshll.u32 %s1532_s4, 4  ;;  %s39_s12 = int_to_ptr.hbm [resolvable:$true] %s38_s12 }
   0x3   :  { %s25_s9 = sshll.u32 %s1083_s30, 4  ;;  %s1084_s13 = smov 128   ;;  %s26_s9 = int_to_ptr.vmem [resolvable:$true] %s25_s9 }
   0x4   :  { %s1085_s14 = smov 8   ;;  %s1086_s15 = smov [#allocation4]  }
   0x5   :  { %31 = dma.hbm_to_vmem [thread:$0]  %s24_s29, 2048, %s26_s9, [#allocation3], %s1084_s13, %s1084_s13, %s1085_s14  }
   0x6   :  { %s40_s16 = sshll.u32 %s1086_s15, 4  ;;  %s41_s16 = int_to_ptr.vmem [resolvable:$true] %s40_s16 }
   0x7   :  { %46 = dma.hbm_to_vmem [thread:$0]  %s39_s12, 2048, %s41_s16, [#allocation5], %s1084_s13, %s1084_s13, %s1085_s14  }
   0x8   :  { %1079 = dma.done.wait [#allocation3], 2048  }
   0x9   :  { %1080 = vsyncadd [#allocation3], 4294965248 }
   0xa   :  { %1081 = dma.done.wait [#allocation5], 2048  }
   0xb   :  { %1082 = vsyncadd [#allocation5], 4294965248  ;;  %v935_v0 = vld [vmem:[%s1529_s1 + $0x38] sm:$0xff]  ;;  %v934_v1 = vld [vmem:[%s1529_s1 + $0x30] sm:$0xff] }
   0xc   :  { %936 = vmatpush.bf16.msra.mxu2 %v935_v0  ;;  %189 = vmatpush.bf16.msra.mxu0 %v935_v0  ;;  %v933_v2 = vld [vmem:[%s1529_s1 + $0x28] sm:$0xff]  ;;  %v932_v3 = vld [vmem:[%s1529_s1 + $0x20] sm:$0xff]  ;;  %v931_v4 = vld [vmem:[%s1529_s1 + $0x18] sm:$0xff] }
   0xd   :  { %v930_v5 = vld [vmem:[%s1529_s1 + $0x10] sm:$0xff]  ;;  %v929_v6 = vld [vmem:[%s1529_s1 + $0x8] sm:$0xff]  ;;  %v928_v7 = vld [vmem:[%s1529_s1] sm:$0xff] }
   0xe   :  { %v1165_v8 = vld [vmem:[%s1528_s0 + $0x20] sm:$0xff]  ;;  %v1177_v10 = vld [vmem:[%s1528_s0 + $0x28] sm:$0xff]  ;;  %v253_v12 = vld [vmem:[#allocation2 + $0x78] sm:$0xff] }
   0xf   :  { %v1170_v9 = vld [vmem:[%s1528_s0] sm:$0xff]  ;;  %v1182_v11 = vld [vmem:[%s1528_s0 + $0x8] sm:$0xff]  ;;  %944 = vmatpush.msra.mxu3 %v253_v12  ;;  %v252_v13 = vld [vmem:[#allocation2 + $0x70] sm:$0xff]  ;;  %258 = vmatpush.msra.mxu1 %v253_v12 }
  0x10   :  { %937 = vmatpush.bf16.msra.mxu2 %v934_v1  ;;  %190 = vmatpush.bf16.msra.mxu0 %v934_v1  ;;  %v251_v14 = vld [vmem:[#allocation2 + $0x68] sm:$0xff]  ;;  %v250_v15 = vld [vmem:[#allocation2 + $0x60] sm:$0xff]  ;;  %v249_v16 = vld [vmem:[#allocation2 + $0x58] sm:$0xff] }
  0x11   :  { %945 = vmatpush.msra.mxu3 %v252_v13  ;;  %259 = vmatpush.msra.mxu1 %v252_v13  ;;  %v248_v17 = vld [vmem:[#allocation2 + $0x50] sm:$0xff]  ;;  %v247_v18 = vld [vmem:[#allocation2 + $0x48] sm:$0xff]  ;;  %v246_v21 = vld [vmem:[#allocation2 + $0x40] sm:$0xff] }
  0x12   :  { %v1189_v19 = vld [vmem:[%s1528_s0 + $0x30] sm:$0xff]  ;;  %v245_v22 = vld [vmem:[#allocation2 + $0x38] sm:$0xff]  ;;  %v243_v24 = vld [vmem:[#allocation2 + $0x28] sm:$0xff] }
  0x13   :  { %946 = vmatpush.msra.mxu3 %v251_v14  ;;  %260 = vmatpush.msra.mxu1 %v251_v14  ;;  %v1194_v20 = vld [vmem:[%s1528_s0 + $0x10] sm:$0xff]  ;;  %v242_v25 = vld [vmem:[#allocation2 + $0x20] sm:$0xff]  ;;  %v241_v26 = vld [vmem:[#allocation2 + $0x18] sm:$0xff] }
  0x14   :  { %938 = vmatpush.bf16.msra.mxu2 %v933_v2  ;;  %191 = vmatpush.bf16.msra.mxu0 %v933_v2  ;;  %v244_v23 = vld [vmem:[#allocation2 + $0x30] sm:$0xff]  ;;  %v239_v28 = vld [vmem:[#allocation2 + $0x8] sm:$0xff]  ;;  %v1201_v29 = vld [vmem:[%s1528_s0 + $0x38] sm:$0xff] }
  0x15   :  { %947 = vmatpush.msra.mxu3 %v250_v15  ;;  %261 = vmatpush.msra.mxu1 %v250_v15  ;;  %v240_v27 = vld [vmem:[#allocation2 + $0x10] sm:$0xff]  ;;  %v1206_v30 = vld [vmem:[%s1528_s0 + $0x18] sm:$0xff]  ;;  %v238_v31 = vld [vmem:[#allocation2] sm:$0xff] }
  0x16   :  { %v964_v61 = vld [vmem:[%s1531_s3] ss:$0 sm:$0xff] }
  0x17   :  { %948 = vmatpush.msra.mxu3 %v249_v16  ;;  %262 = vmatpush.msra.mxu1 %v249_v16 }
  0x18   :  { %939 = vmatpush.bf16.msra.mxu2 %v932_v3  ;;  %192 = vmatpush.bf16.msra.mxu0 %v932_v3 }
  0x19   :  { %949 = vmatpush.msra.mxu3 %v248_v17  ;;  %263 = vmatpush.msra.mxu1 %v248_v17 }
  0x1b   :  { %950 = vmatpush.msra.mxu3 %v247_v18  ;;  %264 = vmatpush.msra.mxu1 %v247_v18 }
  0x1c   :  { %940 = vmatpush.bf16.msra.mxu2 %v931_v4  ;;  %193 = vmatpush.bf16.msra.mxu0 %v931_v4 }
  0x1d   :  { %951 = vmatpush.msra.mxu3 %v246_v21  ;;  %265 = vmatpush.msra.mxu1 %v246_v21 }
  0x1f   :  { %952 = vmatpush.msra.mxu3 %v245_v22  ;;  %266 = vmatpush.msra.mxu1 %v245_v22 }
  0x20   :  { %941 = vmatpush.bf16.msra.mxu2 %v930_v5  ;;  %194 = vmatpush.bf16.msra.mxu0 %v930_v5 }
  0x21   :  { %953 = vmatpush.msra.mxu3 %v244_v23  ;;  %267 = vmatpush.msra.mxu1 %v244_v23 }
  0x23   :  { %954 = vmatpush.msra.mxu3 %v243_v24  ;;  %268 = vmatpush.msra.mxu1 %v243_v24 }
  0x24   :  { %942 = vmatpush.bf16.msra.mxu2 %v929_v6  ;;  %195 = vmatpush.bf16.msra.mxu0 %v929_v6 }
  0x25   :  { %955 = vmatpush.msra.mxu3 %v242_v25  ;;  %269 = vmatpush.msra.mxu1 %v242_v25 }
  0x27   :  { %956 = vmatpush.msra.mxu3 %v241_v26  ;;  %270 = vmatpush.msra.mxu1 %v241_v26 }
  0x28   :  { %943 = vmatpush.bf16.msra.mxu2 %v928_v7  ;;  %196 = vmatpush.bf16.msra.mxu0 %v928_v7 }
  0x29   :  { %957 = vmatpush.msra.mxu3 %v240_v27  ;;  %271 = vmatpush.msra.mxu1 %v240_v27 }
  0x2b   :  { %217 = vmatmul.bf16.vlgmr.msra.gmra.mxu2 %v1165_v8  ;;  %197 = vmatmul.bf16.vlgmr.msra.gmra.mxu0 %v1170_v9 }
  0x2c   :  { %958 = vmatpush.msra.mxu3 %v239_v28  ;;  %272 = vmatpush.msra.mxu1 %v239_v28 }
  0x2e   :  { %959 = vmatpush.msra.mxu3 %v238_v31  ;;  %273 = vmatpush.msra.mxu1 %v238_v31 }
  0x3b   :  { %222 = vmatmul.bf16.gmra.mxu2 %v1177_v10  ;;  %202 = vmatmul.bf16.gmra.mxu0 %v1182_v11 }
  0x4b   :  { %227 = vmatmul.bf16.gmra.mxu2 %v1189_v19  ;;  %207 = vmatmul.bf16.gmra.mxu0 %v1194_v20 }
  0x5b   :  { %232 = vmatmul.bf16.gmra.mxu2 %v1201_v29  ;;  %212 = vmatmul.bf16.gmra.mxu0 %v1206_v30 }
  0xa8   :  { %v198_v32 = vpop.f32.mrf.mxu0 }
  0xa9   :  { %274 = vmatmul.f32.vlgmr.msra.gmra.mxu1 %v198_v32 }
  0xae   :  { %v218_v33 = vpop.f32.mrf.mxu2 }
  0xaf   :  { %298 = vmatmul.f32.vlgmr.msra.gmra.mxu3 %v218_v33 }
  0xb0   :  { %v200_v34 = vpop.f32.mrf.mxu0 }
  0xb1   :  { %277 = vmatmul.f32.gmra.mxu1 %v200_v34 }
  0xb6   :  { %v220_v35 = vpop.f32.mrf.mxu2 }
  0xb7   :  { %301 = vmatmul.f32.gmra.mxu3 %v220_v35 }
  0xb8   :  { %v203_v36 = vpop.f32.mrf.mxu0 }
  0xb9   :  { %280 = vmatmul.f32.gmra.mxu1 %v203_v36 }
  0xbe   :  { %v223_v37 = vpop.f32.mrf.mxu2 }
  0xbf   :  { %304 = vmatmul.f32.gmra.mxu3 %v223_v37 }
  0xc0   :  { %v205_v38 = vpop.f32.mrf.mxu0 }
  0xc1   :  { %283 = vmatmul.f32.gmra.mxu1 %v205_v38 }
  0xc6   :  { %v225_v39 = vpop.f32.mrf.mxu2 }
  0xc7   :  { %307 = vmatmul.f32.gmra.mxu3 %v225_v39 }
  0xc8   :  { %v208_v40 = vpop.f32.mrf.mxu0 }
  0xc9   :  { %286 = vmatmul.f32.gmra.mxu1 %v208_v40 }
  0xce   :  { %v228_v41 = vpop.f32.mrf.mxu2 }
  0xcf   :  { %310 = vmatmul.f32.gmra.mxu3 %v228_v41 }
  0xd0   :  { %v210_v42 = vpop.f32.mrf.mxu0 }
  0xd1   :  { %289 = vmatmul.f32.gmra.mxu1 %v210_v42 }
  0xd6   :  { %v230_v43 = vpop.f32.mrf.mxu2 }
  0xd7   :  { %313 = vmatmul.f32.gmra.mxu3 %v230_v43 }
  0xd8   :  { %v213_v44 = vpop.f32.mrf.mxu0 }
  0xd9   :  { %292 = vmatmul.f32.gmra.mxu1 %v213_v44 }
  0xde   :  { %v233_v45 = vpop.f32.mrf.mxu2 }
  0xdf   :  { %316 = vmatmul.f32.gmra.mxu3 %v233_v45 }
  0xe0   :  { %v215_v46 = vpop.f32.mrf.mxu0 }
  0xe1   :  { %295 = vmatmul.f32.gmra.mxu1 %v215_v46 }
  0xe6   :  { %v235_v47 = vpop.f32.mrf.mxu2 }
  0xe7   :  { %319 = vmatmul.f32.gmra.mxu3 %v235_v47 }
 0x126   :  { %v275_v48 = vpop.f32.mrf.mxu1 }
 0x127   :  { %v276_v40 = vadd.f32 %v964_v61, %v275_v48  ;;  %v411_v48 = vld [vmem:[#allocation4 + $0x78] sm:$0xff] }
 0x128   :  { %416 = vmatpush.msrb.mxu3 %v411_v48 }
 0x129   :  { %v323_v45 = vmax.f32 %v276_v40, 0.0 }
 0x12e   :  { %v278_v50 = vpop.f32.mrf.mxu1 }
 0x12f   :  { %v279_v41 = vadd.f32 %v964_v61, %v278_v50  ;;  %v410_v50 = vld [vmem:[#allocation4 + $0x70] sm:$0xff] }
 0x130   :  { %417 = vmatpush.msrb.mxu3 %v410_v50 }
 0x131   :  { %v324_v46 = vmax.f32 %v279_v41, 0.0 }
 0x132   :  { %v299_v49 = vpop.f32.mrf.mxu3 }
 0x133   :  { %v300_v18 = vadd.f32 %v964_v61, %v299_v49  ;;  %v339_v49 = vpack.c.bf16 %v324_v46, %v323_v45 }
 0x135   :  { %v331_v27 = vmax.f32 %v300_v18, 0.0 }
 0x136   :  { %v281_v53 = vpop.f32.mrf.mxu1 }
 0x137   :  { %v282_v35 = vadd.f32 %v964_v61, %v281_v53  ;;  %v407_v53 = vld [vmem:[#allocation4 + $0x58] sm:$0xff] }
 0x139   :  { %v325_v42 = vmax.f32 %v282_v35, 0.0 }
 0x13a   :  { %v302_v51 = vpop.f32.mrf.mxu3 }
 0x13b   :  { %v303_v15 = vadd.f32 %v964_v61, %v302_v51  ;;  %v409_v51 = vld [vmem:[#allocation4 + $0x68] sm:$0xff] }
 0x13c   :  { %418 = vmatpush.msrb.mxu3 %v409_v51 }
 0x13d   :  { %v332_v23 = vmax.f32 %v303_v15, 0.0 }
 0x13e   :  { %v284_v55 = vpop.f32.mrf.mxu1 }
 0x13f   :  { %v343_v28 = vpack.c.bf16 %v332_v23, %v331_v27  ;;  %v285_v36 = vadd.f32 %v964_v61, %v284_v55  ;;  %v405_v55 = vld [vmem:[#allocation4 + $0x48] sm:$0xff] }
 0x141   :  { %v326_v43 = vmax.f32 %v285_v36, 0.0 }
 0x142   :  { %v305_v52 = vpop.f32.mrf.mxu3 }
 0x143   :  { %v306_v13 = vadd.f32 %v964_v61, %v305_v52  ;;  %v340_v47 = vpack.c.bf16 %v326_v43, %v325_v42  ;;  %v408_v52 = vld [vmem:[#allocation4 + $0x60] sm:$0xff] }
 0x144   :  { %419 = vmatpush.msrb.mxu3 %v408_v52 }
 0x145   :  { %v333_v22 = vmax.f32 %v306_v13, 0.0 }
 0x146   :  { %v287_v57 = vpop.f32.mrf.mxu1  ;;  %420 = vmatpush.msrb.mxu3 %v407_v53 }
 0x147   :  { %v288_v31 = vadd.f32 %v964_v61, %v287_v57  ;;  %v403_v57 = vld [vmem:[#allocation4 + $0x38] sm:$0xff] }
 0x149   :  { %v327_v37 = vmax.f32 %v288_v31, 0.0 }
 0x14a   :  { %v308_v54 = vpop.f32.mrf.mxu3 }
 0x14b   :  { %v309_v6 = vadd.f32 %v964_v61, %v308_v54  ;;  %v406_v54 = vld [vmem:[#allocation4 + $0x50] sm:$0xff] }
 0x14c   :  { %421 = vmatpush.msrb.mxu3 %v406_v54 }
 0x14d   :  { %v334_v16 = vmax.f32 %v309_v6, 0.0 }
 0x14e   :  { %v290_v59 = vpop.f32.mrf.mxu1  ;;  %422 = vmatpush.msrb.mxu3 %v405_v55 }
 0x14f   :  { %v344_v26 = vpack.c.bf16 %v334_v16, %v333_v22  ;;  %v291_v32 = vadd.f32 %v964_v61, %v290_v59  ;;  %v401_v59 = vld [vmem:[#allocation4 + $0x28] sm:$0xff] }
 0x151   :  { %v328_v38 = vmax.f32 %v291_v32, 0.0 }
 0x152   :  { %v311_v56 = vpop.f32.mrf.mxu3 }
 0x153   :  { %v312_v3 = vadd.f32 %v964_v61, %v311_v56  ;;  %v341_v44 = vpack.c.bf16 %v328_v38, %v327_v37  ;;  %v404_v56 = vld [vmem:[#allocation4 + $0x40] sm:$0xff] }
 0x154   :  { %423 = vmatpush.msrb.mxu3 %v404_v56 }
 0x155   :  { %v335_v14 = vmax.f32 %v312_v3, 0.0 }
 0x156   :  { %v293_v63 = vpop.f32.mrf.mxu1  ;;  %424 = vmatpush.msrb.mxu3 %v403_v57 }
 0x157   :  { %v294_v24 = vadd.f32 %v964_v61, %v293_v63  ;;  %v397_v63 = vld [vmem:[#allocation4 + $0x8] sm:$0xff] }
 0x159   :  { %v329_v33 = vmax.f32 %v294_v24, 0.0  ;;  %v965_v24 = vld [vmem:[%s1533_s5] ss:$0 sm:$0xff] }
 0x15a   :  { %v314_v58 = vpop.f32.mrf.mxu3 }
 0x15b   :  { %v315_v1 = vadd.f32 %v964_v61, %v314_v58  ;;  %v402_v58 = vld [vmem:[#allocation4 + $0x30] sm:$0xff] }
 0x15c   :  { %425 = vmatpush.msrb.mxu3 %v402_v58 }
 0x15d   :  { %v336_v7 = vmax.f32 %v315_v1, 0.0 }
 0x15e   :  { %v296_v21 = vpop.f32.mrf.mxu1  ;;  %426 = vmatpush.msrb.mxu3 %v401_v59 }
 0x15f   :  { %v345_v17 = vpack.c.bf16 %v336_v7, %v335_v14  ;;  %v297_v25 = vadd.f32 %v964_v61, %v296_v21 }
 0x161   :  { %v330_v34 = vmax.f32 %v297_v25, 0.0 }
 0x162   :  { %v317_v60 = vpop.f32.mrf.mxu3 }
 0x163   :  { %v318_v62 = vadd.f32 %v964_v61, %v317_v60  ;;  %v342_v39 = vpack.c.bf16 %v330_v34, %v329_v33  ;;  %v400_v60 = vld [vmem:[#allocation4 + $0x20] sm:$0xff] }
 0x164   :  { %427 = vmatpush.msrb.mxu3 %v400_v60 }
 0x165   :  { %v337_v4 = vmax.f32 %v318_v62, 0.0  ;;  %v398_v62 = vld [vmem:[#allocation4 + $0x10] sm:$0xff] }
 0x16a   :  { %v320_v0 = vpop.f32.mrf.mxu3 }
 0x16b   :  { %v321_v2 = vadd.f32 %v964_v61, %v320_v0  ;;  %v399_v61 = vld [vmem:[#allocation4 + $0x18] sm:$0xff]  ;;  %v396_v0 = vld [vmem:[#allocation4] sm:$0xff] }
 0x16c   :  { %428 = vmatpush.msrb.mxu3 %v399_v61 }
 0x16d   :  { %v338_v5 = vmax.f32 %v321_v2, 0.0 }
 0x16e   :  { %429 = vmatpush.msrb.mxu3 %v398_v62 }
 0x16f   :  { %v346_v12 = vpack.c.bf16 %v338_v5, %v337_v4 }
 0x170   :  { %430 = vmatpush.msrb.mxu3 %v397_v63 }
 0x171   :  { %347 = vmatpush.bf16.msrb.mxu2 %v346_v12 }
 0x172   :  { %431 = vmatpush.msrb.mxu3 %v396_v0 }
 0x175   :  { %348 = vmatpush.bf16.msrb.mxu2 %v345_v17 }
 0x179   :  { %349 = vmatpush.bf16.msrb.mxu2 %v344_v26 }
 0x17d   :  { %350 = vmatpush.bf16.msrb.mxu2 %v343_v28 }
 0x181   :  { %351 = vmatpush.bf16.msrb.mxu2 %v342_v39 }
 0x185   :  { %352 = vmatpush.bf16.msrb.mxu2 %v341_v44 }
 0x189   :  { %353 = vmatpush.bf16.msrb.mxu2 %v340_v47 }
 0x18d   :  { %354 = vmatpush.bf16.msrb.mxu2 %v339_v49 }
 0x190   :  { %355 = vmatmul.bf16.vlgmr.msrb.gmra.mxu2 %v1170_v9 }
 0x1a0   :  { %360 = vmatmul.bf16.gmra.mxu2 %v1182_v11 }
 0x1b0   :  { %365 = vmatmul.bf16.gmra.mxu2 %v1194_v20 }
 0x1c0   :  { %370 = vmatmul.bf16.gmra.mxu2 %v1206_v30 }
 0x1d0   :  { %375 = vmatmul.bf16.gmra.mxu2 %v1165_v8 }
 0x1e0   :  { %380 = vmatmul.bf16.gmra.mxu2 %v1177_v10 }
 0x1f0   :  { %385 = vmatmul.bf16.gmra.mxu2 %v1189_v19 }
 0x200   :  { %390 = vmatmul.bf16.gmra.mxu2 %v1201_v29 }
 0x213   :  { %v356_v1 = vpop.f32.mrf.mxu2 }
 0x214   :  { %432 = vmatmul.f32.vlgmr.msrb.gmra.mxu3 %v356_v1 }
 0x21b   :  { %v358_v2 = vpop.f32.mrf.mxu2 }
 0x21c   :  { %435 = vmatmul.f32.gmra.mxu3 %v358_v2 }
 0x223   :  { %v361_v3 = vpop.f32.mrf.mxu2 }
 0x224   :  { %438 = vmatmul.f32.gmra.mxu3 %v361_v3 }
 0x22b   :  { %v363_v4 = vpop.f32.mrf.mxu2 }
 0x22c   :  { %441 = vmatmul.f32.gmra.mxu3 %v363_v4 }
 0x233   :  { %v366_v5 = vpop.f32.mrf.mxu2 }
 0x234   :  { %444 = vmatmul.f32.gmra.mxu3 %v366_v5 }
 0x23b   :  { %v368_v6 = vpop.f32.mrf.mxu2 }
 0x23c   :  { %447 = vmatmul.f32.gmra.mxu3 %v368_v6 }
 0x243   :  { %v371_v7 = vpop.f32.mrf.mxu2 }
 0x244   :  { %450 = vmatmul.f32.gmra.mxu3 %v371_v7 }
 0x24b   :  { %v373_v12 = vpop.f32.mrf.mxu2 }
 0x24c   :  { %453 = vmatmul.f32.gmra.mxu3 %v373_v12 }
 0x253   :  { %v376_v13 = vpop.f32.mrf.mxu2 }
 0x254   :  { %456 = vmatmul.f32.gmra.mxu3 %v376_v13 }
 0x25b   :  { %v378_v14 = vpop.f32.mrf.mxu2 }
 0x25c   :  { %459 = vmatmul.f32.gmra.mxu3 %v378_v14 }
 0x263   :  { %v381_v15 = vpop.f32.mrf.mxu2 }
 0x264   :  { %462 = vmatmul.f32.gmra.mxu3 %v381_v15 }
 0x26b   :  { %v383_v16 = vpop.f32.mrf.mxu2 }
 0x26c   :  { %465 = vmatmul.f32.gmra.mxu3 %v383_v16 }
 0x273   :  { %v386_v17 = vpop.f32.mrf.mxu2 }
 0x274   :  { %468 = vmatmul.f32.gmra.mxu3 %v386_v17 }
 0x27b   :  { %v388_v18 = vpop.f32.mrf.mxu2 }
 0x27c   :  { %471 = vmatmul.f32.gmra.mxu3 %v388_v18 }
 0x283   :  { %v391_v21 = vpop.f32.mrf.mxu2 }
 0x284   :  { %474 = vmatmul.f32.gmra.mxu3 %v391_v21 }
 0x28b   :  { %v393_v22 = vpop.f32.mrf.mxu2 }
 0x28c   :  { %477 = vmatmul.f32.gmra.mxu3 %v393_v22 }
 0x297   :  { %v433_v23 = vpop.f32.mrf.mxu3 }
 0x298   :  { %v434_v25 = vadd.f32 %v965_v24, %v433_v23 }
 0x29a   :  { %v481_v28 = vmax.f32 %v434_v25, 0.0  ;;  %v568_v25 = vld [vmem:[%s1534_s6 + $0x70] sm:$0xff] }
 0x29f   :  { %v436_v26 = vpop.f32.mrf.mxu3 }
 0x2a0   :  { %v437_v27 = vadd.f32 %v965_v24, %v436_v26  ;;  %v562_v26 = vld [vmem:[%s1534_s6 + $0x40] sm:$0xff] }
 0x2a2   :  { %v482_v31 = vmax.f32 %v437_v27, 0.0  ;;  %v561_v27 = vld [vmem:[%s1534_s6 + $0x38] sm:$0xff] }
 0x2a4   :  { %v497_v32 = vpack.c.bf16 %v482_v31, %v481_v28  ;;  %v560_v28 = vld [vmem:[%s1534_s6 + $0x30] sm:$0xff]  ;;  %v559_v31 = vld [vmem:[%s1534_s6 + $0x28] sm:$0xff] }
 0x2a7   :  { %v439_v33 = vpop.f32.mrf.mxu3 }
 0x2a8   :  { %v440_v34 = vadd.f32 %v965_v24, %v439_v33  ;;  %v557_v33 = vld [vmem:[%s1534_s6 + $0x18] sm:$0xff] }
 0x2aa   :  { %v483_v37 = vmax.f32 %v440_v34, 0.0  ;;  %v555_v34 = vld [vmem:[%s1534_s6 + $0x8] sm:$0xff] }
 0x2af   :  { %v442_v35 = vpop.f32.mrf.mxu3 }
 0x2b0   :  { %v443_v36 = vadd.f32 %v965_v24, %v442_v35  ;;  %v554_v35 = vld [vmem:[%s1534_s6] sm:$0xff] }
 0x2b2   :  { %v484_v38 = vmax.f32 %v443_v36, 0.0 }
 0x2b4   :  { %v498_v39 = vpack.c.bf16 %v484_v38, %v483_v37 }
 0x2b7   :  { %v445_v40 = vpop.f32.mrf.mxu3 }
 0x2b8   :  { %v446_v41 = vadd.f32 %v965_v24, %v445_v40 }
 0x2ba   :  { %v485_v44 = vmax.f32 %v446_v41, 0.0 }
 0x2bf   :  { %v448_v42 = vpop.f32.mrf.mxu3 }
 0x2c0   :  { %v449_v43 = vadd.f32 %v965_v24, %v448_v42 }
 0x2c2   :  { %v486_v45 = vmax.f32 %v449_v43, 0.0 }
 0x2c4   :  { %v499_v46 = vpack.c.bf16 %v486_v45, %v485_v44 }
 0x2c7   :  { %v451_v47 = vpop.f32.mrf.mxu3 }
 0x2c8   :  { %v452_v49 = vadd.f32 %v965_v24, %v451_v47 }
 0x2ca   :  { %v487_v51 = vmax.f32 %v452_v49, 0.0 }
 0x2cf   :  { %v454_v48 = vpop.f32.mrf.mxu3 }
 0x2d0   :  { %v455_v50 = vadd.f32 %v965_v24, %v454_v48  ;;  %v639_v48 = vlaneseq }
 0x2d2   :  { %v488_v52 = vmax.f32 %v455_v50, 0.0 }
 0x2d4   :  { %v500_v53 = vpack.c.bf16 %v488_v52, %v487_v51  ;;  %v1280_v51 = vand.u32 127, %v639_v48  ;;  %v1285_v52 = vld [vmem:[%s1535_s7] ss:$0 sm:$0xff] }
 0x2d6   :  { %vm641_vm0 = vcmp.lt.s32.totalorder %v1280_v51, 2 }
 0x2d7   :  { %v457_v54 = vpop.f32.mrf.mxu3 }
 0x2d8   :  { %v458_v16 = vadd.f32 %v965_v24, %v457_v54 }
 0x2da   :  { %v489_v22 = vmax.f32 %v458_v16, 0.0 }
 0x2df   :  { %v460_v55 = vpop.f32.mrf.mxu3 }
 0x2e0   :  { %v461_v13 = vadd.f32 %v965_v24, %v460_v55 }
 0x2e2   :  { %v490_v18 = vmax.f32 %v461_v13, 0.0 }
 0x2e4   :  { %v501_v23 = vpack.c.bf16 %v490_v18, %v489_v22 }
 0x2e7   :  { %v463_v56 = vpop.f32.mrf.mxu3 }
 0x2e8   :  { %v464_v7 = vadd.f32 %v965_v24, %v463_v56 }
 0x2ea   :  { %v491_v17 = vmax.f32 %v464_v7, 0.0 }
 0x2ef   :  { %v466_v57 = vpop.f32.mrf.mxu3 }
 0x2f0   :  { %v467_v4 = vadd.f32 %v965_v24, %v466_v57 }
 0x2f2   :  { %v492_v14 = vmax.f32 %v467_v4, 0.0 }
 0x2f4   :  { %v502_v21 = vpack.c.bf16 %v492_v14, %v491_v17 }
 0x2f7   :  { %v469_v58 = vpop.f32.mrf.mxu3 }
 0x2f8   :  { %v470_v1 = vadd.f32 %v965_v24, %v469_v58 }
 0x2fa   :  { %v493_v12 = vmax.f32 %v470_v1, 0.0 }
 0x2ff   :  { %v472_v59 = vpop.f32.mrf.mxu3 }
 0x300   :  { %v473_v63 = vadd.f32 %v965_v24, %v472_v59 }
 0x302   :  { %v494_v5 = vmax.f32 %v473_v63, 0.0 }
 0x304   :  { %v503_v15 = vpack.c.bf16 %v494_v5, %v493_v12 }
 0x307   :  { %v475_v60 = vpop.f32.mrf.mxu3 }
 0x308   :  { %v476_v61 = vadd.f32 %v965_v24, %v475_v60 }
 0x30a   :  { %v495_v2 = vmax.f32 %v476_v61, 0.0 }
 0x30f   :  { %v478_v62 = vpop.f32.mrf.mxu3 }
 0x310   :  { %v479_v0 = vadd.f32 %v965_v24, %v478_v62  ;;  %v569_v24 = vld [vmem:[%s1534_s6 + $0x78] sm:$0xff] }
 0x311   :  { %574 = vmatpush.msrb.mxu1 %v569_v24 }
 0x312   :  { %v496_v3 = vmax.f32 %v479_v0, 0.0 }
 0x313   :  { %575 = vmatpush.msrb.mxu1 %v568_v25 }
 0x314   :  { %v504_v6 = vpack.c.bf16 %v496_v3, %v495_v2 }
 0x316   :  { %505 = vmatpush.bf16.msrb.mxu0 %v504_v6 }
 0x31a   :  { %506 = vmatpush.bf16.msrb.mxu0 %v503_v15 }
 0x31e   :  { %507 = vmatpush.bf16.msrb.mxu0 %v502_v21 }
 0x322   :  { %508 = vmatpush.bf16.msrb.mxu0 %v501_v23 }
 0x326   :  { %509 = vmatpush.bf16.msrb.mxu0 %v500_v53 }
 0x32a   :  { %510 = vmatpush.bf16.msrb.mxu0 %v499_v46 }
 0x32e   :  { %511 = vmatpush.bf16.msrb.mxu0 %v498_v39 }
 0x332   :  { %512 = vmatpush.bf16.msrb.mxu0 %v497_v32  ;;  %v558_v32 = vld [vmem:[%s1534_s6 + $0x20] sm:$0xff] }
 0x335   :  { %513 = vmatmul.bf16.vlgmr.msrb.gmra.mxu0 %v1170_v9  ;;  %v567_v9 = vld [vmem:[%s1534_s6 + $0x68] sm:$0xff] }
 0x336   :  { %576 = vmatpush.msrb.mxu1 %v567_v9 }
 0x345   :  { %518 = vmatmul.bf16.gmra.mxu0 %v1182_v11  ;;  %v566_v11 = vld [vmem:[%s1534_s6 + $0x60] sm:$0xff] }
 0x346   :  { %577 = vmatpush.msrb.mxu1 %v566_v11 }
 0x355   :  { %523 = vmatmul.bf16.gmra.mxu0 %v1194_v20  ;;  %v565_v20 = vld [vmem:[%s1534_s6 + $0x58] sm:$0xff] }
 0x356   :  { %578 = vmatpush.msrb.mxu1 %v565_v20 }
 0x365   :  { %528 = vmatmul.bf16.gmra.mxu0 %v1206_v30  ;;  %v563_v30 = vld [vmem:[%s1534_s6 + $0x48] sm:$0xff] }
 0x375   :  { %533 = vmatmul.bf16.gmra.mxu0 %v1165_v8  ;;  %v564_v8 = vld [vmem:[%s1534_s6 + $0x50] sm:$0xff] }
 0x376   :  { %579 = vmatpush.msrb.mxu1 %v564_v8 }
 0x378   :  { %580 = vmatpush.msrb.mxu1 %v563_v30 }
 0x37a   :  { %581 = vmatpush.msrb.mxu1 %v562_v26 }
 0x37c   :  { %582 = vmatpush.msrb.mxu1 %v561_v27 }
 0x37e   :  { %583 = vmatpush.msrb.mxu1 %v560_v28 }
 0x380   :  { %584 = vmatpush.msrb.mxu1 %v559_v31 }
 0x382   :  { %585 = vmatpush.msrb.mxu1 %v558_v32 }
 0x384   :  { %586 = vmatpush.msrb.mxu1 %v557_v33 }
 0x385   :  { %538 = vmatmul.bf16.gmra.mxu0 %v1177_v10  ;;  %v556_v10 = vld [vmem:[%s1534_s6 + $0x10] sm:$0xff] }
 0x386   :  { %587 = vmatpush.msrb.mxu1 %v556_v10 }
 0x388   :  { %588 = vmatpush.msrb.mxu1 %v555_v34 }
 0x38a   :  { %589 = vmatpush.msrb.mxu1 %v554_v35 }
 0x395   :  { %543 = vmatmul.bf16.gmra.mxu0 %v1189_v19 }
 0x3a5   :  { %548 = vmatmul.bf16.gmra.mxu0 %v1201_v29 }
 0x3b2   :  { %v514_v36 = vpop.f32.mrf.mxu0 }
 0x3b3   :  { %590 = vmatmul.f32.vlgmr.msrb.gmra.mxu1 %v514_v36 }
 0x3ba   :  { %v516_v37 = vpop.f32.mrf.mxu0 }
 0x3bb   :  { %593 = vmatmul.f32.gmra.mxu1 %v516_v37 }
 0x3c2   :  { %v519_v38 = vpop.f32.mrf.mxu0 }
 0x3c3   :  { %596 = vmatmul.f32.gmra.mxu1 %v519_v38 }
 0x3ca   :  { %v521_v39 = vpop.f32.mrf.mxu0 }
 0x3cb   :  { %599 = vmatmul.f32.gmra.mxu1 %v521_v39 }
 0x3d2   :  { %v524_v40 = vpop.f32.mrf.mxu0 }
 0x3d3   :  { %602 = vmatmul.f32.gmra.mxu1 %v524_v40 }
 0x3da   :  { %v526_v41 = vpop.f32.mrf.mxu0 }
 0x3db   :  { %605 = vmatmul.f32.gmra.mxu1 %v526_v41 }
 0x3e2   :  { %v529_v42 = vpop.f32.mrf.mxu0 }
 0x3e3   :  { %608 = vmatmul.f32.gmra.mxu1 %v529_v42 }
 0x3ea   :  { %v531_v43 = vpop.f32.mrf.mxu0 }
 0x3eb   :  { %611 = vmatmul.f32.gmra.mxu1 %v531_v43 }
 0x3f2   :  { %v534_v44 = vpop.f32.mrf.mxu0 }
 0x3f3   :  { %614 = vmatmul.f32.gmra.mxu1 %v534_v44 }
 0x3fa   :  { %v536_v19 = vpop.f32.mrf.mxu0 }
 0x3fb   :  { %617 = vmatmul.f32.gmra.mxu1 %v536_v19 }
 0x402   :  { %v539_v29 = vpop.f32.mrf.mxu0 }
 0x403   :  { %620 = vmatmul.f32.gmra.mxu1 %v539_v29 }
 0x40a   :  { %v541_v45 = vpop.f32.mrf.mxu0 }
 0x40b   :  { %623 = vmatmul.f32.gmra.mxu1 %v541_v45 }
 0x412   :  { %v544_v46 = vpop.f32.mrf.mxu0 }
 0x413   :  { %626 = vmatmul.f32.gmra.mxu1 %v544_v46 }
 0x41a   :  { %v546_v47 = vpop.f32.mrf.mxu0 }
 0x41b   :  { %629 = vmatmul.f32.gmra.mxu1 %v546_v47 }
 0x422   :  { %v549_v49 = vpop.f32.mrf.mxu0 }
 0x423   :  { %632 = vmatmul.f32.gmra.mxu1 %v549_v49 }
 0x42a   :  { %v551_v50 = vpop.f32.mrf.mxu0 }
 0x42b   :  { %635 = vmatmul.f32.gmra.mxu1 %v551_v50 }
 0x430   :  { %v591_v53 = vpop.f32.mrf.mxu1 }
 0x431   :  { %v592_v54 = vadd.f32 %v1285_v52, %v591_v53 }
 0x433   :  { %v1291_v55 = vsel %vm641_vm0, %v592_v54, -1e+30 }
 0x434   :  { %658 = vmax.xlane.f32.xlu0 %v1291_v55 }
 0x438   :  { %v594_v56 = vpop.f32.mrf.mxu1 }
 0x439   :  { %v595_v57 = vadd.f32 %v1285_v52, %v594_v56 }
 0x43b   :  { %v1297_v58 = vsel %vm641_vm0, %v595_v57, -1e+30 }
 0x43c   :  { %660 = vmax.xlane.f32.xlu0 %v1297_v58 }
 0x440   :  { %v597_v59 = vpop.f32.mrf.mxu1 }
 0x441   :  { %v598_v60 = vadd.f32 %v1285_v52, %v597_v59 }
 0x443   :  { %v1303_v61 = vsel %vm641_vm0, %v598_v60, -1e+30 }
 0x444   :  { %662 = vmax.xlane.f32.xlu1 %v1303_v61 }
 0x448   :  { %v600_v62 = vpop.f32.mrf.mxu1 }
 0x449   :  { %v601_v63 = vadd.f32 %v1285_v52, %v600_v62 }
 0x44b   :  { %v1309_v0 = vsel %vm641_vm0, %v601_v63, -1e+30 }
 0x44c   :  { %664 = vmax.xlane.f32.xlu1 %v1309_v0 }
 0x450   :  { %v603_v1 = vpop.f32.mrf.mxu1 }
 0x451   :  { %v604_v2 = vadd.f32 %v1285_v52, %v603_v1 }
 0x453   :  { %v1315_v3 = vsel %vm641_vm0, %v604_v2, -1e+30 }
 0x454   :  { %666 = vmax.xlane.f32.xlu2 %v1315_v3 }
 0x458   :  { %v606_v4 = vpop.f32.mrf.mxu1 }
 0x459   :  { %v607_v5 = vadd.f32 %v1285_v52, %v606_v4 }
 0x45b   :  { %v1321_v6 = vsel %vm641_vm0, %v607_v5, -1e+30 }
 0x45c   :  { %668 = vmax.xlane.f32.xlu2 %v1321_v6 }
 0x460   :  { %v609_v7 = vpop.f32.mrf.mxu1 }
 0x461   :  { %v610_v12 = vadd.f32 %v1285_v52, %v609_v7 }
 0x463   :  { %v1327_v13 = vsel %vm641_vm0, %v610_v12, -1e+30 }
 0x464   :  { %670 = vmax.xlane.f32.xlu0 %v1327_v13 }
 0x468   :  { %v612_v14 = vpop.f32.mrf.mxu1 }
 0x469   :  { %v613_v15 = vadd.f32 %v1285_v52, %v612_v14 }
 0x46b   :  { %v1333_v16 = vsel %vm641_vm0, %v613_v15, -1e+30 }
 0x46c   :  { %672 = vmax.xlane.f32.xlu1 %v1333_v16 }
 0x470   :  { %v615_v17 = vpop.f32.mrf.mxu1 }
 0x471   :  { %v616_v18 = vadd.f32 %v1285_v52, %v615_v17 }
 0x473   :  { %v1339_v21 = vsel %vm641_vm0, %v616_v18, -1e+30 }
 0x474   :  { %674 = vmax.xlane.f32.xlu2 %v1339_v21 }
 0x478   :  { %v618_v22 = vpop.f32.mrf.mxu1 }
 0x479   :  { %v619_v23 = vadd.f32 %v1285_v52, %v618_v22 }
 0x47b   :  { %v1345_v24 = vsel %vm641_vm0, %v619_v23, -1e+30 }
 0x47c   :  { %676 = vmax.xlane.f32.xlu0 %v1345_v24 }
 0x480   :  { %v621_v25 = vpop.f32.mrf.mxu1 }
 0x481   :  { %v622_v9 = vadd.f32 %v1285_v52, %v621_v25 }
 0x483   :  { %v1351_v11 = vsel %vm641_vm0, %v622_v9, -1e+30 }
 0x484   :  { %678 = vmax.xlane.f32.xlu1 %v1351_v11 }
 0x488   :  { %v624_v20 = vpop.f32.mrf.mxu1 }
 0x489   :  { %v625_v8 = vadd.f32 %v1285_v52, %v624_v20 }
 0x48b   :  { %v1357_v30 = vsel %vm641_vm0, %v625_v8, -1e+30 }
 0x48c   :  { %680 = vmax.xlane.f32.xlu2 %v1357_v30 }
 0x490   :  { %v627_v26 = vpop.f32.mrf.mxu1 }
 0x491   :  { %v628_v27 = vadd.f32 %v1285_v52, %v627_v26 }
 0x493   :  { %v1363_v28 = vsel %vm641_vm0, %v628_v27, -1e+30 }
 0x494   :  { %682 = vmax.xlane.f32.xlu0 %v1363_v28 }
 0x498   :  { %v630_v31 = vpop.f32.mrf.mxu1 }
 0x499   :  { %v631_v32 = vadd.f32 %v1285_v52, %v630_v31 }
 0x49b   :  { %v1369_v33 = vsel %vm641_vm0, %v631_v32, -1e+30 }
 0x49c   :  { %684 = vmax.xlane.f32.xlu1 %v1369_v33 }
 0x4a0   :  { %v633_v10 = vpop.f32.mrf.mxu1 }
 0x4a1   :  { %v634_v34 = vadd.f32 %v1285_v52, %v633_v10 }
 0x4a3   :  { %v1375_v35 = vsel %vm641_vm0, %v634_v34, -1e+30 }
 0x4a4   :  { %686 = vmax.xlane.f32.xlu2 %v1375_v35 }
 0x4a7   :  { %v1378_v36 = vpop.xlane.xlu0 %658 }
 0x4a8   :  { %v690_v37 = vsub.f32 %v1291_v55, %v1378_v36  ;;  %v636_v38 = vpop.f32.mrf.mxu1 }
 0x4a9   :  { %v637_v39 = vadd.f32 %v1285_v52, %v636_v38 }
 0x4aa   :  { %v706_v40 = vmul.f32 1.442695, %v690_v37 }
 0x4ab   :  { %v1385_v41 = vsel %vm641_vm0, %v637_v39, -1e+30 }
 0x4ac   :  { %967 = vpow2.f32 %v706_v40  ;;  %688 = vmax.xlane.f32.xlu0 %v1385_v41 }
 0x4af   :  { %v1388_v42 = vpop.xlane.xlu0 %660 }
 0x4b0   :  { %v691_v43 = vsub.f32 %v1297_v58, %v1388_v42 }
 0x4b2   :  { %v968_v44 = vpop.eup %967  ;;  %v708_v19 = vmul.f32 1.442695, %v691_v43 }
 0x4b3   :  { %738 = vadd.xlane.f32.xlu1 %v968_v44 }
 0x4b4   :  { %969 = vpow2.f32 %v708_v19 }
 0x4b7   :  { %v1392_v29 = vpop.xlane.xlu1 %662 }
 0x4b8   :  { %v692_v45 = vsub.f32 %v1303_v61, %v1392_v29 }
 0x4ba   :  { %v970_v46 = vpop.eup %969  ;;  %v710_v47 = vmul.f32 1.442695, %v692_v45 }
 0x4bb   :  { %740 = vadd.xlane.f32.xlu2 %v970_v46 }
 0x4bc   :  { %971 = vpow2.f32 %v710_v47 }
 0x4bf   :  { %v1396_v49 = vpop.xlane.xlu1 %664 }
 0x4c0   :  { %v693_v48 = vsub.f32 %v1309_v0, %v1396_v49 }
 0x4c2   :  { %v972_v50 = vpop.eup %971  ;;  %v712_v51 = vmul.f32 1.442695, %v693_v48 }
 0x4c3   :  { %742 = vadd.xlane.f32.xlu0 %v972_v50 }
 0x4c4   :  { %973 = vpow2.f32 %v712_v51 }
 0x4c7   :  { %v1400_v52 = vpop.xlane.xlu2 %666 }
 0x4c8   :  { %v694_v53 = vsub.f32 %v1315_v3, %v1400_v52 }
 0x4ca   :  { %v974_v54 = vpop.eup %973  ;;  %v714_v56 = vmul.f32 1.442695, %v694_v53 }
 0x4cb   :  { %744 = vadd.xlane.f32.xlu1 %v974_v54 }
 0x4cc   :  { %975 = vpow2.f32 %v714_v56 }
 0x4cf   :  { %v1404_v57 = vpop.xlane.xlu2 %668 }
 0x4d0   :  { %v695_v59 = vsub.f32 %v1321_v6, %v1404_v57 }
 0x4d2   :  { %v976_v60 = vpop.eup %975  ;;  %v716_v62 = vmul.f32 1.442695, %v695_v59 }
 0x4d3   :  { %746 = vadd.xlane.f32.xlu2 %v976_v60 }
 0x4d4   :  { %977 = vpow2.f32 %v716_v62 }
 0x4d7   :  { %v1408_v63 = vpop.xlane.xlu0 %670 }
 0x4d8   :  { %v696_v1 = vsub.f32 %v1327_v13, %v1408_v63 }
 0x4da   :  { %v978_v2 = vpop.eup %977  ;;  %v718_v4 = vmul.f32 1.442695, %v696_v1 }
 0x4db   :  { %748 = vadd.xlane.f32.xlu0 %v978_v2 }
 0x4dc   :  { %979 = vpow2.f32 %v718_v4 }
 0x4df   :  { %v1412_v5 = vpop.xlane.xlu1 %672 }
 0x4e0   :  { %v697_v7 = vsub.f32 %v1333_v16, %v1412_v5 }
 0x4e2   :  { %v980_v12 = vpop.eup %979  ;;  %v720_v14 = vmul.f32 1.442695, %v697_v7 }
 0x4e3   :  { %750 = vadd.xlane.f32.xlu1 %v980_v12 }
 0x4e4   :  { %981 = vpow2.f32 %v720_v14 }
 0x4e7   :  { %v1416_v15 = vpop.xlane.xlu2 %674 }
 0x4e8   :  { %v698_v17 = vsub.f32 %v1339_v21, %v1416_v15 }
 0x4ea   :  { %v982_v18 = vpop.eup %981  ;;  %v722_v22 = vmul.f32 1.442695, %v698_v17 }
 0x4eb   :  { %752 = vadd.xlane.f32.xlu2 %v982_v18 }
 0x4ec   :  { %983 = vpow2.f32 %v722_v22 }
 0x4ef   :  { %v1420_v23 = vpop.xlane.xlu0 %676 }
 0x4f0   :  { %v699_v25 = vsub.f32 %v1345_v24, %v1420_v23 }
 0x4f2   :  { %v984_v9 = vpop.eup %983  ;;  %v724_v20 = vmul.f32 1.442695, %v699_v25 }
 0x4f3   :  { %754 = vadd.xlane.f32.xlu0 %v984_v9 }
 0x4f4   :  { %985 = vpow2.f32 %v724_v20 }
 0x4f7   :  { %v1424_v8 = vpop.xlane.xlu1 %678 }
 0x4f8   :  { %v700_v26 = vsub.f32 %v1351_v11, %v1424_v8 }
 0x4fa   :  { %v986_v27 = vpop.eup %985  ;;  %v726_v31 = vmul.f32 1.442695, %v700_v26 }
 0x4fb   :  { %756 = vadd.xlane.f32.xlu1 %v986_v27 }
 0x4fc   :  { %987 = vpow2.f32 %v726_v31 }
 0x4ff   :  { %v1428_v32 = vpop.xlane.xlu2 %680 }
 0x500   :  { %v701_v10 = vsub.f32 %v1357_v30, %v1428_v32 }
 0x502   :  { %v988_v34 = vpop.eup %987  ;;  %v728_v37 = vmul.f32 1.442695, %v701_v10 }
 0x503   :  { %758 = vadd.xlane.f32.xlu2 %v988_v34 }
 0x504   :  { %989 = vpow2.f32 %v728_v37 }
 0x507   :  { %v1432_v38 = vpop.xlane.xlu0 %682 }
 0x508   :  { %v702_v39 = vsub.f32 %v1363_v28, %v1432_v38 }
 0x50a   :  { %v990_v40 = vpop.eup %989  ;;  %v730_v43 = vmul.f32 1.442695, %v702_v39 }
 0x50b   :  { %760 = vadd.xlane.f32.xlu0 %v990_v40 }
 0x50c   :  { %991 = vpow2.f32 %v730_v43 }
 0x50f   :  { %v1436_v44 = vpop.xlane.xlu1 %684 }
 0x510   :  { %v703_v19 = vsub.f32 %v1369_v33, %v1436_v44 }
 0x512   :  { %v992_v45 = vpop.eup %991  ;;  %v732_v46 = vmul.f32 1.442695, %v703_v19 }
 0x513   :  { %762 = vadd.xlane.f32.xlu1 %v992_v45 }
 0x514   :  { %993 = vpow2.f32 %v732_v46 }
 0x517   :  { %v1440_v47 = vpop.xlane.xlu2 %686 }
 0x518   :  { %v704_v48 = vsub.f32 %v1375_v35, %v1440_v47 }
 0x51a   :  { %v994_v50 = vpop.eup %993  ;;  %v734_v51 = vmul.f32 1.442695, %v704_v48 }
 0x51b   :  { %764 = vadd.xlane.f32.xlu2 %v994_v50 }
 0x51c   :  { %995 = vpow2.f32 %v734_v51 }
 0x51f   :  { %v1444_v53 = vpop.xlane.xlu0 %688 }
 0x520   :  { %v705_v54 = vsub.f32 %v1385_v41, %v1444_v53 }
 0x522   :  { %v996_v56 = vpop.eup %995  ;;  %v736_v59 = vmul.f32 1.442695, %v705_v54 }
 0x523   :  { %766 = vadd.xlane.f32.xlu0 %v996_v56 }
 0x524   :  { %997 = vpow2.f32 %v736_v59 }
 0x526   :  { %v739_v60 = vpop.xlane.xlu1 %738 }
 0x527   :  { %999 = vlog2.f32 %v739_v60 }
 0x52a   :  { %v998_v62 = vpop.eup %997 }
 0x52b   :  { %768 = vadd.xlane.f32.xlu1 %v998_v62 }
 0x52d   :  { %v1000_v1 = vpop.eup %999 }
 0x52e   :  { %v771_v2 = vmul.f32 0.6931472, %v1000_v1  ;;  %v741_v4 = vpop.xlane.xlu2 %740 }
 0x52f   :  { %1001 = vlog2.f32 %v741_v4 }
 0x530   :  { %v802_v7 = vadd.f32 %v771_v2, %v1378_v36 }
 0x532   :  { %v818_v12 = vsub.f32 %v1291_v55, %v802_v7 }
 0x534   :  { %834 = vst [vmem:[%s1536_s8] sm:$0xff] %v818_v12 }
 0x535   :  { %v1002_v14 = vpop.eup %1001 }
 0x536   :  { %v773_v17 = vmul.f32 0.6931472, %v1002_v14  ;;  %v743_v18 = vpop.xlane.xlu0 %742 }
 0x537   :  { %1003 = vlog2.f32 %v743_v18 }
 0x538   :  { %v803_v22 = vadd.f32 %v773_v17, %v1388_v42 }
 0x53a   :  { %v819_v25 = vsub.f32 %v1297_v58, %v803_v22 }
 0x53c   :  { %835 = vst [vmem:[%s1536_s8 + $0x8] sm:$0xff] %v819_v25 }
 0x53d   :  { %v1004_v9 = vpop.eup %1003 }
 0x53e   :  { %v775_v36 = vmul.f32 0.6931472, %v1004_v9  ;;  %v745_v20 = vpop.xlane.xlu1 %744 }
 0x53f   :  { %1005 = vlog2.f32 %v745_v20 }
 0x540   :  { %v804_v55 = vadd.f32 %v775_v36, %v1392_v29 }
 0x542   :  { %v820_v26 = vsub.f32 %v1303_v61, %v804_v55 }
 0x544   :  { %836 = vst [vmem:[%s1536_s8 + $0x10] sm:$0xff] %v820_v26 }
 0x545   :  { %v1006_v27 = vpop.eup %1005 }
 0x546   :  { %v777_v42 = vmul.f32 0.6931472, %v1006_v27  ;;  %v747_v31 = vpop.xlane.xlu2 %746 }
 0x547   :  { %1007 = vlog2.f32 %v747_v31 }
 0x548   :  { %v805_v58 = vadd.f32 %v777_v42, %v1396_v49 }
 0x54a   :  { %v821_v10 = vsub.f32 %v1309_v0, %v805_v58 }
 0x54c   :  { %837 = vst [vmem:[%s1536_s8 + $0x18] sm:$0xff] %v821_v10 }
 0x54d   :  { %v1008_v34 = vpop.eup %1007 }
 0x54e   :  { %v779_v29 = vmul.f32 0.6931472, %v1008_v34  ;;  %v749_v37 = vpop.xlane.xlu0 %748 }
 0x54f   :  { %1009 = vlog2.f32 %v749_v37 }
 0x550   :  { %v806_v61 = vadd.f32 %v779_v29, %v1400_v52 }
 0x552   :  { %v822_v39 = vsub.f32 %v1315_v3, %v806_v61 }
 0x554   :  { %838 = vst [vmem:[%s1536_s8 + $0x20] sm:$0xff] %v822_v39 }
 0x555   :  { %v1010_v40 = vpop.eup %1009 }
 0x556   :  { %v781_v49 = vmul.f32 0.6931472, %v1010_v40  ;;  %v751_v43 = vpop.xlane.xlu1 %750 }
 0x557   :  { %1011 = vlog2.f32 %v751_v43 }
 0x558   :  { %v807_v0 = vadd.f32 %v781_v49, %v1404_v57 }
 0x55a   :  { %v823_v19 = vsub.f32 %v1321_v6, %v807_v0 }
 0x55c   :  { %839 = vst [vmem:[%s1536_s8 + $0x28] sm:$0xff] %v823_v19 }
 0x55d   :  { %v1012_v45 = vpop.eup %1011 }
 0x55e   :  { %v783_v52 = vmul.f32 0.6931472, %v1012_v45  ;;  %v753_v46 = vpop.xlane.xlu2 %752 }
 0x55f   :  { %1013 = vlog2.f32 %v753_v46 }
 0x560   :  { %v808_v3 = vadd.f32 %v783_v52, %v1408_v63 }
 0x562   :  { %v824_v48 = vsub.f32 %v1327_v13, %v808_v3 }
 0x564   :  { %840 = vst [vmem:[%s1536_s8 + $0x30] sm:$0xff] %v824_v48 }
 0x565   :  { %v1014_v50 = vpop.eup %1013 }
 0x566   :  { %v785_v57 = vmul.f32 0.6931472, %v1014_v50  ;;  %v755_v51 = vpop.xlane.xlu0 %754 }
 0x567   :  { %1015 = vlog2.f32 %v755_v51 }
 0x568   :  { %v809_v6 = vadd.f32 %v785_v57, %v1412_v5 }
 0x56a   :  { %v825_v54 = vsub.f32 %v1333_v16, %v809_v6 }
 0x56c   :  { %841 = vst [vmem:[%s1536_s8 + $0x38] sm:$0xff] %v825_v54 }
 0x56d   :  { %v1016_v56 = vpop.eup %1015 }
 0x56e   :  { %v787_v63 = vmul.f32 0.6931472, %v1016_v56  ;;  %v757_v59 = vpop.xlane.xlu1 %756 }
 0x56f   :  { %1017 = vlog2.f32 %v757_v59 }
 0x570   :  { %v810_v13 = vadd.f32 %v787_v63, %v1416_v15 }
 0x572   :  { %v826_v60 = vsub.f32 %v1339_v21, %v810_v13 }
 0x574   :  { %842 = vst [vmem:[%s1536_s8 + $0x40] sm:$0xff] %v826_v60 }
 0x575   :  { %v1018_v62 = vpop.eup %1017 }
 0x576   :  { %v789_v5 = vmul.f32 0.6931472, %v1018_v62  ;;  %v759_v1 = vpop.xlane.xlu2 %758 }
 0x577   :  { %1019 = vlog2.f32 %v759_v1 }
 0x578   :  { %v811_v16 = vadd.f32 %v789_v5, %v1420_v23 }
 0x57a   :  { %v827_v2 = vsub.f32 %v1345_v24, %v811_v16 }
 0x57c   :  { %843 = vst [vmem:[%s1536_s8 + $0x48] sm:$0xff] %v827_v2 }
 0x57d   :  { %v1020_v4 = vpop.eup %1019 }
 0x57e   :  { %v791_v15 = vmul.f32 0.6931472, %v1020_v4  ;;  %v761_v7 = vpop.xlane.xlu0 %760 }
 0x57f   :  { %1021 = vlog2.f32 %v761_v7 }
 0x580   :  { %v812_v21 = vadd.f32 %v791_v15, %v1424_v8 }
 0x582   :  { %v828_v12 = vsub.f32 %v1351_v11, %v812_v21 }
 0x584   :  { %844 = vst [vmem:[%s1536_s8 + $0x50] sm:$0xff] %v828_v12 }
 0x585   :  { %v1022_v14 = vpop.eup %1021 }
 0x586   :  { %v793_v23 = vmul.f32 0.6931472, %v1022_v14  ;;  %v763_v17 = vpop.xlane.xlu1 %762 }
 0x587   :  { %1023 = vlog2.f32 %v763_v17 }
 0x588   :  { %v813_v24 = vadd.f32 %v793_v23, %v1428_v32 }
 0x58a   :  { %v829_v18 = vsub.f32 %v1357_v30, %v813_v24 }
 0x58c   :  { %845 = vst [vmem:[%s1536_s8 + $0x58] sm:$0xff] %v829_v18 }
 0x58d   :  { %v1024_v22 = vpop.eup %1023 }
 0x58e   :  { %v795_v8 = vmul.f32 0.6931472, %v1024_v22  ;;  %v765_v25 = vpop.xlane.xlu2 %764 }
 0x58f   :  { %1025 = vlog2.f32 %v765_v25 }
 0x590   :  { %v814_v11 = vadd.f32 %v795_v8, %v1432_v38 }
 0x592   :  { %v830_v9 = vsub.f32 %v1363_v28, %v814_v11 }
 0x594   :  { %846 = vst [vmem:[%s1536_s8 + $0x60] sm:$0xff] %v830_v9 }
 0x595   :  { %v1026_v36 = vpop.eup %1025 }
 0x596   :  { %v797_v32 = vmul.f32 0.6931472, %v1026_v36  ;;  %v767_v20 = vpop.xlane.xlu0 %766 }
 0x597   :  { %1027 = vlog2.f32 %v767_v20 }
 0x598   :  { %v815_v30 = vadd.f32 %v797_v32, %v1436_v44 }
 0x59a   :  { %v831_v55 = vsub.f32 %v1369_v33, %v815_v30 }
 0x59c   :  { %847 = vst [vmem:[%s1536_s8 + $0x68] sm:$0xff] %v831_v55 }
 0x59d   :  { %v1028_v26 = vpop.eup %1027 }
 0x59e   :  { %v799_v38 = vmul.f32 0.6931472, %v1028_v26  ;;  %v769_v27 = vpop.xlane.xlu1 %768 }
 0x59f   :  { %1029 = vlog2.f32 %v769_v27 }
 0x5a0   :  { %v816_v28 = vadd.f32 %v799_v38, %v1440_v47 }
 0x5a2   :  { %v832_v42 = vsub.f32 %v1375_v35, %v816_v28 }
 0x5a4   :  { %848 = vst [vmem:[%s1536_s8 + $0x70] sm:$0xff] %v832_v42 }
 0x5a5   :  { %v1030_v31 = vpop.eup %1029 }
 0x5a6   :  { %v801_v44 = vmul.f32 0.6931472, %v1030_v31 }
 0x5a8   :  { %v817_v33 = vadd.f32 %v801_v44, %v1444_v53 }
 0x5aa   :  { %v833_v58 = vsub.f32 %v1385_v41, %v817_v33 }
 0x5ac   :  { %849 = vst [vmem:[%s1536_s8 + $0x78] sm:$0xff] %v833_v58 }
 0x5ad   :  { %854 = vsyncpa [#allocation3], 1 }
 0x5ae   :  { %855 = vsyncpa [#allocation5], 1 }

</bundles_post_ra>
